<compile_context>
chip_gen: v6e
topology: v6e:2x2x1
jax: 0.10.0
libtpu: 0.0.40
codegen_flags: <defaults>
</compile_context>

<pallas_src>
import functools

import jax
import jax.numpy as jnp
from jax.experimental import pallas as pl
from jax.experimental.pallas import tpu as pltpu


_VMEM_LIMIT_BYTES = 32 * 1024 * 1024   # explicit scoped-VMEM limit (fits v5e/v6e/v7x)
_TILE_BUDGET_BYTES = 8 * 1024 * 1024   # budget for pipelined tiles + in-kernel temps


# ---------------------------------------------------------------------------
# Kernels
# ---------------------------------------------------------------------------

def _silu(y):
    """SiLU with the divide pushed onto the EUP slot (approx vrcp); ~2^-12 relative error.

    The exp argument is clamped so very negative y cannot produce inf before the reciprocal.
    """
    e = jnp.exp(jnp.minimum(-y, 60.0))
    return y * pl.reciprocal(1.0 + e, approx=True)


def _stats_kernel(x_ref, w1_ref, shift_ref, stats_ref, sum_scr, max_scr,
                  *, thw, hw, tiles_per_split, needs_mask):
    # x_ref:     (Cin, thw)   input tile (any float dtype; cast to bf16 for the MXU)
    # w1_ref:    (Cout, Cin)  bf16, BN scale folded in
    # shift_ref: (Cout, 1)    f32 folded BN shift
    # stats_ref: (Cout, 2)    f32 per-(split, batch) [spatial sum | spatial max]
    # sum_scr / max_scr: (Cout, 1) f32 running accumulators along the t axis
    #
    # CORRECTNESS GUARD: the accumulators rely on t (grid axis 2) being the innermost,
    # sequentially iterated ("arbitrary") axis with re-init at t==0 per (s, n).  Do not
    # make t "parallel" or reorder the grid.
    s = pl.program_id(0)
    t = pl.program_id(2)

    # channel_adapt: 1x1 conv (bf16 MXU, f32 accumulate) + folded BN shift + SiLU (f32).
    x = x_ref[...].astype(jnp.bfloat16)
    y = jnp.dot(w1_ref[...], x, preferred_element_type=jnp.float32)     # (Cout, thw)
    y = y + shift_ref[...]
    y = _silu(y)

    if needs_mask:
        # Spatial padding lives only in the globally-last tile; padded columns would
        # otherwise contribute SiLU(shift) to the pooled statistics.
        start = (s * tiles_per_split + t) * thw
        lane = jax.lax.broadcasted_iota(jnp.int32, y.shape, 1)
        valid = lane < (hw - start)
        y_sum = jnp.where(valid, y, 0.0)
        y_max = jnp.where(valid, y, -jnp.inf)
    else:
        y_sum, y_max = y, y

    tile_sum = jnp.sum(y_sum, axis=1, keepdims=True)                    # (Cout, 1)
    tile_max = jnp.max(y_max, axis=1, keepdims=True)                    # (Cout, 1)

    @pl.when(t == 0)
    def _():
        sum_scr[...] = tile_sum
        max_scr[...] = tile_max

    @pl.when(t > 0)
    def _():
        sum_scr[...] = sum_scr[...] + tile_sum
        max_scr[...] = jnp.maximum(max_scr[...], tile_max)

    @pl.when(t == pl.num_programs(2) - 1)
    def _():
        stats_ref[...] = jnp.concatenate([sum_scr[...], max_scr[...]], axis=1)


def _apply_kernel(x_ref, w1_ref, shift_ref, att_ref, o_ref):
    # Recompute y for this tile and apply the per-batch channel attention.
    # o_ref: (Cout, thw) -- lane-dense store (thw is a multiple of 128).
    x = x_ref[...].astype(jnp.bfloat16)
    y = jnp.dot(w1_ref[...], x, preferred_element_type=jnp.float32)     # (Cout, thw)
    y = y + shift_ref[...]
    y = _silu(y)
    o_ref[...] = (y * att_ref[...]).astype(o_ref.dtype)


# ---------------------------------------------------------------------------
# Tiling / wrapper
# ---------------------------------------------------------------------------

def _choose_spatial_tiles(hw_pad, cin, cout, x_bytes, out_bytes,
                          budget_bytes=_TILE_BUDGET_BYTES):
    """Per-pass spatial tile sizes: multiples of 128 dividing hw_pad.

    VMEM accounting per spatial position (double-buffered tiles + in-kernel temps):
      stats pass: 2*x_bytes*Cin (pipelined x) + 2*Cin (bf16 copy) + 8*Cout (f32 y + temp)
      apply pass: stats + 2*out_bytes*Cout (pipelined output tile)
    HBM roofline saturates by ~512-1024 lanes, so tiles are additionally capped well below
    what the budget alone would allow (keeps headroom on v7x's 64 MiB/TC VMEM).
    """
    stats_pp = (2 * x_bytes + 2) * cin + 8 * cout
    apply_pp = stats_pp + 2 * out_bytes * cout

    def pick(per_pos, max_lanes):
        cap = max(128, min(max_lanes, (budget_bytes // per_pos) // 128 * 128))
        t = min(hw_pad, cap)
        while hw_pad % t:        # hw_pad is a multiple of 128, so this terminates at <=128
            t -= 128
        return t

    return pick(stats_pp, 8192), pick(apply_pp, 4096)


def feature_adapter(x_nchw, kparams, out_dtype=None):
    """x_nchw: (N, Cin, H, W) float32 or bfloat16. Returns (N, Cout, H, W) in out_dtype."""
    w1 = kparams["w1"]          # (Cout, Cin) bf16, BN scale folded
    shift = kparams["shift"]    # (Cout, 1) f32
    wm1 = kparams["wm1"]        # (Cred, Cout) f32
    wm2 = kparams["wm2"]        # (Cout, Cred) f32

    N, Cin, H, W = x_nchw.shape
    Cout = w1.shape[0]
    HW = H * W
    out_dtype = x_nchw.dtype if out_dtype is None else out_dtype

    # NCHW-native view (no transpose); pad the spatial axis to a multiple of 128 if needed.
    HW_pad = ((HW + 127) // 128) * 128
    x = x_nchw.reshape(N, Cin, HW)
    needs_mask = HW_pad != HW
    if needs_mask:
        x = jnp.pad(x, ((0, 0), (0, 0), (0, HW_pad - HW)))

    thw_stats, thw_apply = _choose_spatial_tiles(
        HW_pad, Cin, Cout, x.dtype.itemsize, jnp.dtype(out_dtype).itemsize)
    tiles_stats = HW_pad // thw_stats
    tiles_apply = HW_pad // thw_apply

    # Spatial core-split for the stats pass (v7x megacore): when N is odd the batch axis
    # alone can leave a TensorCore idle, so split the spatial tiles into S=2 halves on a
    # leading parallel axis.  Same total grid iterations, so harmless on v5e/v6e.
    S = 2 if (N % 2 == 1 and tiles_stats >= 2 and tiles_stats % 2 == 0) else 1
    tiles_per_split = tiles_stats // S

    # -------- pass 1: per-(split, batch) pooled partial stats --------
    stats = pl.pallas_call(
        functools.partial(_stats_kernel, thw=thw_stats, hw=HW,
                          tiles_per_split=tiles_per_split, needs_mask=needs_mask),
        out_shape=jax.ShapeDtypeStruct((S, N, Cout, 2), jnp.float32),
        grid_spec=pltpu.PrefetchScalarGridSpec(
            num_scalar_prefetch=0,
            grid=(S, N, tiles_per_split),
            in_specs=[
                pl.BlockSpec((pl.Squeezed(), Cin, thw_stats),
                             lambda s, n, t: (n, 0, s * tiles_per_split + t)),
                pl.BlockSpec(w1.shape, lambda s, n, t: (0, 0)),
                pl.BlockSpec(shift.shape, lambda s, n, t: (0, 0)),
            ],
            out_specs=pl.BlockSpec((pl.Squeezed(), pl.Squeezed(), Cout, 2),
                                   lambda s, n, t: (s, n, 0, 0)),
            scratch_shapes=[pltpu.VMEM((Cout, 1), jnp.float32),
                            pltpu.VMEM((Cout, 1), jnp.float32)],
        ),
        compiler_params=pltpu.CompilerParams(
            dimension_semantics=("parallel", "parallel", "arbitrary"),
            vmem_limit_bytes=_VMEM_LIMIT_BYTES),
    )(x, w1, shift)

    # -------- tiny combine + attention MLP epilogue (O(N*Cout), exact f32, plain JAX) ----
    total_sum = jnp.sum(stats[..., 0], axis=0)                          # (N, Cout)
    total_max = jnp.max(stats[..., 1], axis=0)                          # (N, Cout)
    avg = total_sum * (1.0 / float(HW))
    silu = lambda v: v * jax.nn.sigmoid(v)
    mlp = lambda p: silu(p @ wm1.T) @ wm2.T
    att = jax.nn.sigmoid(mlp(avg) + mlp(total_max))                     # (N, Cout)
    att = att[:, :, None].astype(jnp.float32)                           # (N, Cout, 1)

    # -------- pass 2: recompute y per tile and apply attention (fully parallel) --------
    out = pl.pallas_call(
        _apply_kernel,
        out_shape=jax.ShapeDtypeStruct((N, Cout, HW_pad), out_dtype),
        grid_spec=pltpu.PrefetchScalarGridSpec(
            num_scalar_prefetch=0,
            grid=(N, tiles_apply),
            in_specs=[
                pl.BlockSpec((pl.Squeezed(), Cin, thw_apply), lambda n, t: (n, 0, t)),
                pl.BlockSpec(w1.shape, lambda n, t: (0, 0)),
                pl.BlockSpec(shift.shape, lambda n, t: (0, 0)),
                pl.BlockSpec((pl.Squeezed(), Cout, 1), lambda n, t: (n, 0, 0)),
            ],
            out_specs=pl.BlockSpec((pl.Squeezed(), Cout, thw_apply), lambda n, t: (n, 0, t)),
        ),
        compiler_params=pltpu.CompilerParams(
            dimension_semantics=("parallel", "parallel"),
            vmem_limit_bytes=_VMEM_LIMIT_BYTES),
    )(x, w1, shift, att)

    if needs_mask:
        out = out[:, :, :HW]
    return out.reshape(N, Cout, H, W)               # already NCHW: no transpose


# ---------------------------------------------------------------------------
# Params + pure-JAX reference
# ---------------------------------------------------------------------------

def make_params(key, in_channels, out_channels, reduction_ratio=16):
    """Torch-like parameters (Conv weights + BatchNorm eval-mode statistics)."""
    c_red = max(1, out_channels // reduction_ratio)
    ks = jax.random.split(key, 7)
    w1 = jax.random.normal(ks[0], (out_channels, in_channels), jnp.float32) * 0.1
    gamma = 1.0 + 0.1 * jax.random.normal(ks[1], (out_channels,), jnp.float32)
    beta = 0.05 * jax.random.normal(ks[2], (out_channels,), jnp.float32)
    running_mean = 0.1 * jax.random.normal(ks[3], (out_channels,), jnp.float32)
    running_var = jnp.abs(jax.random.normal(ks[4], (out_channels,), jnp.float32)) + 0.5
    wm1 = jax.random.normal(ks[5], (c_red, out_channels), jnp.float32) * 0.1
    wm2 = jax.random.normal(ks[6], (out_channels, c_red), jnp.float32) * 0.1
    return {"w1": w1, "gamma": gamma, "beta": beta,
            "running_mean": running_mean, "running_var": running_var,
            "wm1": wm1, "wm2": wm2}


def prepare_kernel_params(params, eps=1e-5):
    """Fold BN (eval mode) into the conv weight / a shift vector; cast the conv weight to bf16."""
    scale = params["gamma"] / jnp.sqrt(params["running_var"] + eps)
    shift = params["beta"] - params["running_mean"] * scale
    return {
        # bf16 MXU weights are the sole source of the loosened 1e-2 tolerance (inference use).
        "w1": (params["w1"] * scale[:, None]).astype(jnp.bfloat16),  # (Cout, Cin)
        "shift": shift[:, None].astype(jnp.float32),                 # (Cout, 1)
        "wm1": params["wm1"].astype(jnp.float32),                    # (Cred, Cout)
        "wm2": params["wm2"].astype(jnp.float32),                    # (Cout, Cred)
    }


def feature_adapter_ref(x_nchw, params, eps=1e-5):
    """Pure-JAX f32 reference mirroring the PyTorch forward (BatchNorm in eval mode)."""
    silu = lambda v: v * jax.nn.sigmoid(v)
    y = jnp.einsum("oc,nchw->nohw", params["w1"], x_nchw)
    scale = params["gamma"] / jnp.sqrt(params["running_var"] + eps)
    shift = params["beta"] - params["running_mean"] * scale
    y = y * scale[None, :, None, None] + shift[None, :, None, None]
    y = silu(y)
    avg = jnp.mean(y, axis=(2, 3))                                   # (N, Cout)
    mx = jnp.max(y, axis=(2, 3))                                     # (N, Cout)
    mlp = lambda p: silu(p @ params["wm1"].T) @ params["wm2"].T
    att = jax.nn.sigmoid(mlp(avg) + mlp(mx))                         # (N, Cout)
    return y * att[:, :, None, None]


if __name__ == "__main__":
    key = jax.random.PRNGKey(0)
    k_x, k_p, k_x2 = jax.random.split(key, 3)

    # Case 1: HW a multiple of 128 (no padding path).
    N, Cin, H, W = 2, 8, 16, 16
    Cout = 32                                   # reduction_ratio=16 -> hidden = 2
    x = jax.random.normal(k_x, (N, Cin, H, W), jnp.float32)
    params = make_params(k_p, Cin, Cout)
    kparams = prepare_kernel_params(params)

    out = jax.block_until_ready(feature_adapter(x, kparams))
    ref = feature_adapter_ref(x, params)
    assert out.shape == (N, Cout, H, W)
    assert jnp.allclose(out, ref, atol=1e-2, rtol=1e-2), "mismatch vs reference (case 1)"

    # Case 2: odd spatial size (HW=100) -> exercises the padded + masked-pool path.
    x2 = jax.random.normal(k_x2, (1, Cin, 10, 10), jnp.float32)
    out2 = jax.block_until_ready(feature_adapter(x2, kparams))
    ref2 = feature_adapter_ref(x2, params)
    assert out2.shape == (1, Cout, 10, 10)
    assert jnp.allclose(out2, ref2, atol=1e-2, rtol=1e-2), "mismatch vs reference (case 2)"

    print("KERNEL_OK")
</pallas_src>

<mosaic_0001>
module attributes {stable_mosaic.version = 11 : i64} {
  func.func @_stats_kernel(%arg0: i32, %arg1: i32, %arg2: i32, %arg3: memref<1x8x256xf32, #tpu.memory_space<vmem>>, %arg4: memref<32x8xbf16, #tpu.memory_space<vmem>>, %arg5: memref<32x1xf32, #tpu.memory_space<vmem>>, %arg6: memref<1x1x32x2xf32, #tpu.memory_space<vmem>>, %arg7: memref<32x1xf32, #tpu.memory_space<vmem>>, %arg8: memref<32x1xf32, #tpu.memory_space<vmem>>) attributes {dimension_semantics = [#tpu.dimension_semantics<parallel>, #tpu.dimension_semantics<parallel>, #tpu.dimension_semantics<arbitrary>], iteration_bounds = array<i64: 1, 2, 1>, scalar_prefetch = 0 : i64, scratch_operands = 2 : i64, tpu.core_type = #tpu.core_type<tc>, window_params = [{transform_indices = @transform_0, window_bounds = array<i64: 1, 8, 256>}, {pipeline_mode = #tpu.pipeline_mode<synchronous>, transform_indices = @transform_1, window_bounds = array<i64: 32, 8>}, {pipeline_mode = #tpu.pipeline_mode<synchronous>, transform_indices = @transform_2, window_bounds = array<i64: 32, 1>}, {transform_indices = @transform_3, window_bounds = array<i64: 1, 1, 32, 2>}]} {
    %c0 = arith.constant 0 : index
    %c0_0 = arith.constant 0 : index
    %c0_1 = arith.constant 0 : index
    %0 = vector.load %arg3[%c0, %c0_0, %c0_1] : memref<1x8x256xf32, #tpu.memory_space<vmem>>, vector<1x8x256xf32>
    %1 = vector.shape_cast %0 : vector<1x8x256xf32> to vector<8x256xf32>
    %2 = arith.truncf %1 : vector<8x256xf32> to vector<8x256xbf16>
    %c0_2 = arith.constant 0 : index
    %c0_3 = arith.constant 0 : index
    %3 = vector.load %arg4[%c0_2, %c0_3] : memref<32x8xbf16, #tpu.memory_space<vmem>>, vector<32x8xbf16>
    %cst = arith.constant dense<0.000000e+00> : vector<32x256xf32>
    %4 = tpu.matmul %3, %2, %cst {dimension_numbers = #tpu.dot_dimension_numbers<[1], [0], [0], [1], [0, 0, 1, 1], [], []>} : vector<32x8xbf16>, vector<8x256xbf16>, vector<32x256xf32> -> vector<32x256xf32>
    %c0_4 = arith.constant 0 : index
    %c0_5 = arith.constant 0 : index
    %5 = vector.load %arg5[%c0_4, %c0_5] : memref<32x1xf32, #tpu.memory_space<vmem>>, vector<32x1xf32>
    %6 = vector.broadcast %5 : vector<32x1xf32> to vector<32x256xf32>
    %7 = arith.addf %4, %6 : vector<32x256xf32>
    %cst_6 = arith.constant 0.000000e+00 : f32
    %8 = vector.broadcast %cst_6 : f32 to vector<32x256xf32>
    %9 = arith.subf %8, %7 : vector<32x256xf32>
    %cst_7 = arith.constant 6.000000e+01 : f32
    %10 = vector.broadcast %cst_7 : f32 to vector<32x256xf32>
    %11 = arith.minimumf %9, %10 : vector<32x256xf32>
    %12 = math.exp %11 : vector<32x256xf32>
    %cst_8 = arith.constant 1.000000e+00 : f32
    %13 = vector.broadcast %cst_8 : f32 to vector<32x256xf32>
    %14 = arith.addf %13, %12 : vector<32x256xf32>
    %15 = tpu.reciprocal %14 {approx = true} : vector<32x256xf32> -> vector<32x256xf32>
    %16 = arith.mulf %7, %15 : vector<32x256xf32>
    %cst_9 = arith.constant dense<0.000000e+00> : vector<32xf32>
    %17 = vector.multi_reduction <add>, %16, %cst_9 [1] : vector<32x256xf32> to vector<32xf32>
    %18 = vector.shape_cast %17 : vector<32xf32> to vector<32x1xf32>
    %cst_10 = arith.constant dense<0xFF800000> : vector<32xf32>
    %19 = vector.multi_reduction <maximumf>, %16, %cst_10 [1] : vector<32x256xf32> to vector<32xf32>
    %20 = vector.shape_cast %19 : vector<32xf32> to vector<32x1xf32>
    %c0_i32 = arith.constant 0 : i32
    %21 = arith.cmpi eq, %arg2, %c0_i32 : i32
    %22 = arith.extui %21 : i1 to i32
    %c0_i32_11 = arith.constant 0 : i32
    %23 = arith.cmpi ne, %22, %c0_i32_11 : i32
    scf.if %23 {
      %c0_16 = arith.constant 0 : index
      %c0_17 = arith.constant 0 : index
      %30 = vector.load %arg7[%c0_16, %c0_17] : memref<32x1xf32, #tpu.memory_space<vmem>>, vector<32x1xf32>
      tpu.vector_store %arg7[%c0_16, %c0_17], %18 {strides = array<i32>} : memref<32x1xf32, #tpu.memory_space<vmem>>, vector<32x1xf32>,
      %c0_18 = arith.constant 0 : index
      %c0_19 = arith.constant 0 : index
      %31 = vector.load %arg8[%c0_18, %c0_19] : memref<32x1xf32, #tpu.memory_space<vmem>>, vector<32x1xf32>
      tpu.vector_store %arg8[%c0_18, %c0_19], %20 {strides = array<i32>} : memref<32x1xf32, #tpu.memory_space<vmem>>, vector<32x1xf32>,
    } else {
    }
    %c0_i32_12 = arith.constant 0 : i32
    %24 = arith.cmpi sgt, %arg2, %c0_i32_12 : i32
    %25 = arith.extui %24 : i1 to i32
    %c0_i32_13 = arith.constant 0 : i32
    %26 = arith.cmpi ne, %25, %c0_i32_13 : i32
    scf.if %26 {
      %c0_16 = arith.constant 0 : index
      %c0_17 = arith.constant 0 : index
      %30 = vector.load %arg7[%c0_16, %c0_17] : memref<32x1xf32, #tpu.memory_space<vmem>>, vector<32x1xf32>
      %31 = arith.addf %30, %18 : vector<32x1xf32>
      %c0_18 = arith.constant 0 : index
      %c0_19 = arith.constant 0 : index
      %32 = vector.load %arg7[%c0_18, %c0_19] : memref<32x1xf32, #tpu.memory_space<vmem>>, vector<32x1xf32>
      tpu.vector_store %arg7[%c0_18, %c0_19], %31 {strides = array<i32>} : memref<32x1xf32, #tpu.memory_space<vmem>>, vector<32x1xf32>,
      %c0_20 = arith.constant 0 : index
      %c0_21 = arith.constant 0 : index
      %33 = vector.load %arg8[%c0_20, %c0_21] : memref<32x1xf32, #tpu.memory_space<vmem>>, vector<32x1xf32>
      %34 = arith.maximumf %33, %20 : vector<32x1xf32>
      %c0_22 = arith.constant 0 : index
      %c0_23 = arith.constant 0 : index
      %35 = vector.load %arg8[%c0_22, %c0_23] : memref<32x1xf32, #tpu.memory_space<vmem>>, vector<32x1xf32>
      tpu.vector_store %arg8[%c0_22, %c0_23], %34 {strides = array<i32>} : memref<32x1xf32, #tpu.memory_space<vmem>>, vector<32x1xf32>,
    } else {
    }
    %c0_i32_14 = arith.constant 0 : i32
    %27 = arith.cmpi eq, %arg2, %c0_i32_14 : i32
    %28 = arith.extui %27 : i1 to i32
    %c0_i32_15 = arith.constant 0 : i32
    %29 = arith.cmpi ne, %28, %c0_i32_15 : i32
    scf.if %29 {
      %c0_16 = arith.constant 0 : index
      %c0_17 = arith.constant 0 : index
      %30 = vector.load %arg7[%c0_16, %c0_17] : memref<32x1xf32, #tpu.memory_space<vmem>>, vector<32x1xf32>
      %c0_18 = arith.constant 0 : index
      %c0_19 = arith.constant 0 : index
      %31 = vector.load %arg8[%c0_18, %c0_19] : memref<32x1xf32, #tpu.memory_space<vmem>>, vector<32x1xf32>
      %32 = tpu.concatenate %30, %31 in 1 : vector<32x1xf32>, vector<32x1xf32> -> vector<32x2xf32>
      %c0_20 = arith.constant 0 : index
      %c0_21 = arith.constant 0 : index
      %c0_22 = arith.constant 0 : index
      %c0_23 = arith.constant 0 : index
      %33 = vector.load %arg6[%c0_20, %c0_21, %c0_22, %c0_23] : memref<1x1x32x2xf32, #tpu.memory_space<vmem>>, vector<1x1x32x2xf32>
      %34 = vector.shape_cast %33 : vector<1x1x32x2xf32> to vector<32x2xf32>
      %35 = vector.shape_cast %32 : vector<32x2xf32> to vector<1x1x32x2xf32>
      tpu.vector_store %arg6[%c0_20, %c0_21, %c0_22, %c0_23], %35 {strides = array<i32>} : memref<1x1x32x2xf32, #tpu.memory_space<vmem>>, vector<1x1x32x2xf32>,
    } else {
    }
    return
  }
  func.func @transform_0(%arg0: i32, %arg1: i32, %arg2: i32) -> (i32, i32, i32) {
    %c1_i32 = arith.constant 1 : i32
    %0 = arith.muli %arg0, %c1_i32 : i32
    %1 = arith.addi %0, %arg2 : i32
    %c0_i32 = arith.constant 0 : i32
    %c0_i32_0 = arith.constant 0 : i32
    return %arg1, %c0_i32, %1 : i32, i32, i32
  }
  func.func @transform_1(%arg0: i32, %arg1: i32, %arg2: i32) -> (i32, i32) {
    %c0_i32 = arith.constant 0 : i32
    %c0_i32_0 = arith.constant 0 : i32
    %c0_i32_1 = arith.constant 0 : i32
    return %c0_i32, %c0_i32_0 : i32, i32
  }
  func.func @transform_2(%arg0: i32, %arg1: i32, %arg2: i32) -> (i32, i32) {
    %c0_i32 = arith.constant 0 : i32
    %c0_i32_0 = arith.constant 0 : i32
    %c0_i32_1 = arith.constant 0 : i32
    return %c0_i32, %c0_i32_0 : i32, i32
  }
  func.func @transform_3(%arg0: i32, %arg1: i32, %arg2: i32) -> (i32, i32, i32, i32) {
    %c0_i32 = arith.constant 0 : i32
    %c0_i32_0 = arith.constant 0 : i32
    %c0_i32_1 = arith.constant 0 : i32
    return %arg0, %arg1, %c0_i32, %c0_i32_0 : i32, i32, i32, i32
  }
}

</mosaic_0001>

<bundles_post_ra>
// kernel: tpu_custom_call.1
= control target key start
LH: loop header
LB: loop body
LE: loop exit
PB: predicated region body
PF: predicated region fallthrough
CT: control target
= control target key end

     0   :  { %s712_s12 = smov 0   ;;  %s714_s13 = smov 0   ;;  %s807_s0 = inlined_call_operand.vmem [shape: f32[2,8,256], index: 0, kind: input, shape index: {}]   ;;  %s808_s1 = inlined_call_operand.vmem [shape: bf16[32,8], index: 1, kind: input, shape index: {}]   ;;  %s809_s2 = inlined_call_operand.vmem [shape: f32[32,1], index: 2, kind: input, shape index: {}]   ;;  %s810_s3 = inlined_call_operand.vmem [shape: f32[1,2,32,2], index: 3, kind: output, shape index: {}]  }
   0x1   :  { %s716_s14 = smov 0  }
   0x2 LB: > { %s28_s15 = sadd.s32 1, %s684_s13  ;;  %p588_p0 = scmp.ge.s32.totalorder %s688_s14, 1  ;;  %s688_s14 = sphi %s716_s14, %s13_s14   ;;  %s684_s13 = sphi %s714_s13, %s812_s13   ;;  %s680_s12 = sphi %s712_s12, %s811_s12  }
   0x3   : > { %p30_p1 = scmp.ge.s32.totalorder %s28_s15, 2  ;;  %p169_p2 = scmp.lt.s32.totalorder %s688_s14, 3 }
   0x5   : > { %s814_s15 = smov (%p30_p1, %s28_s15), 0  ;;  %p170_p3 = pnand %p588_p0, %p169_p2 }
   0x6   : > { %p204_p4 = scmp.lt.s32.totalorder (!%p170_p3), %s680_s12, 1  ;;  %s691_s5 = smov (!%p170_p3), 1  }
   0x7   : > { %173 = sbr.rel (%p170_p3) target bundleno = 531 (0x213), region = 32 }
   0xc   : > { %v690_v0 = vmov 0   ;;  %s816_s12 = smov (!%p204_p4, %s680_s12), 1  ;;  %v232_v1 = vld [vmem:[%s809_s2] sm:$0xff]  ;;  %v234_v2 = vld [vmem:[%s809_s2 + $0x10] sm:$0xff]  ;;  %v233_v3 = vld [vmem:[%s809_s2 + $0x8] sm:$0xff]  ;;  %vm273_vm0 = vcmask 1043456  }
   0xd   : > { %312 = vmatprep.mubr.bf16.mxu0 %v690_v0  ;;  %322 = vmatprep.mubr.bf16.mxu1 %v690_v0  ;;  %s600_s20 = sshll.u32 %s816_s12, 4  ;;  %v235_v4 = vld [vmem:[%s809_s2 + $0x18] sm:$0xff]  ;;  %v632_v10 = vld [vmem:[%s808_s1] sm:$0xff]   ;;  %v633_v11 = vld [vmem:[%s808_s1 + $0x8] sm:$0xff]   ;;  %vm266_vm1 = vcmask 64512   ;;  %vm417_vm2 = vcmask 7168  }
   0xe   : > { %630 = vset.pattern.permute.xlu0 %v690_v0  ;;  %631 = vset.pattern.permute.xlu1 %v690_v0  ;;  %s211_s27 = scalar_lea.vmem %s807_s0, %s600_s20  ;;  %s601_s6 = sshll.u32 %s816_s12, 5  ;;  %vm487_vm3 = vcmask 15360  }
   0xf   : > { %238 = vperm.xlu0 %630, %v232_v1   ;;  %248 = vperm.xlu1 %631, %v234_v2   ;;  %v225_v5 = vld [vmem:[%s211_s27 + $0x8] sm:$0xff]  ;;  %v224_v6 = vld [vmem:[%s211_s27] sm:$0xff]  ;;  %s222_s9 = scalar_lea.vmem %s810_s3, %s601_s6 }
  0x10   : > { %v227_v7 = vpack.c.bf16 %v225_v5, %v225_v5  ;;  %v226_v8 = vpack.c.bf16 %v224_v6, %v224_v6 }
  0x12   : > { %595 = vmatprep.subr.msk.bf16.mxu0 %vm273_vm0, %v227_v7  ;;  %602 = vmatprep.subr.msk.bf16.mxu1 %vm273_vm0, %v227_v7  ;;  %v275_v9 = vsel %vm273_vm0, %v226_v8, 0 }
  0x13   : > { %243 = vperm.xlu0 %630, %v233_v3   ;;  %253 = vperm.xlu1 %631, %v235_v4  }
  0x14   : > { %295 = vmatpush1.bf16.msra.mxu0 %v275_v9  ;;  %603 = vmatpush1.bf16.msra.mxu1 %v275_v9 }
  0x17   : > { %596 = vmatmul.mubr.msk.bf16.vlgmr.msra.gmra.mxu0 %vm266_vm1, %v632_v10  ;;  %597 = vmatmul.mubr.msk.bf16.vlgmr.msra.gmra.mxu1 %vm266_vm1, %v633_v11 }
  0x8a   : > { %v249_v12 = vpop.permute.xlu1 %248  ;;  %v239_v13 = vpop.permute.xlu0 %238 }
  0x8e   : > { %v254_v24 = vpop.permute.xlu1 %253  ;;  %v244_v29 = vpop.permute.xlu0 %243 }
  0xd7   : > { %v314_v14 = vpop.f32.mrf.mxu0  ;;  %v324_v15 = vpop.f32.mrf.mxu1 }
  0xd8   : > { %v754_v16 = vadd.f32 %v314_v14, %v239_v13  ;;  %v756_v17 = vadd.f32 %v324_v15, %v249_v12 }
  0xd9   : > { %v316_v18 = vpop.f32.mrf.mxu0  ;;  %v326_v19 = vpop.f32.mrf.mxu1 }
  0xda   : > { %v333_v20 = vsub.f32 0.0, %v754_v16  ;;  %v337_v21 = vsub.f32 0.0, %v756_v17  ;;  %v760_v22 = vadd.f32 %v316_v18, %v239_v13  ;;  %v762_v23 = vadd.f32 %v326_v19, %v249_v12 }
  0xdb   : > { %v318_v25 = vpop.f32.mrf.mxu0  ;;  %v328_v26 = vpop.f32.mrf.mxu1 }
  0xdc   : > { %v341_v27 = vmin.f32 %v333_v20, 60.0  ;;  %v345_v28 = vmin.f32 %v337_v21, 60.0  ;;  %v334_v30 = vsub.f32 0.0, %v760_v22  ;;  %v338_v31 = vsub.f32 0.0, %v762_v23 }
  0xdd   : > { %v766_v32 = vadd.f32 %v318_v25, %v244_v29  ;;  %v768_v33 = vadd.f32 %v328_v26, %v254_v24  ;;  %v320_v34 = vpop.f32.mrf.mxu0  ;;  %v330_v35 = vpop.f32.mrf.mxu1 }
  0xde   : > { %v349_v36 = vmul.f32 1.442695, %v341_v27  ;;  %v357_v37 = vmul.f32 1.442695, %v345_v28  ;;  %v342_v38 = vmin.f32 %v334_v30, 60.0  ;;  %v346_v39 = vmin.f32 %v338_v31, 60.0 }
  0xdf   : > { %v335_v40 = vsub.f32 0.0, %v766_v32  ;;  %v339_v41 = vsub.f32 0.0, %v768_v33  ;;  %v321_v42 = vadd.f32 %v320_v34, %v244_v29  ;;  %v331_v43 = vadd.f32 %v330_v35, %v254_v24 }
  0xe0   : > { %634 = vpow2.f32 %v349_v36  ;;  %v351_v44 = vmul.f32 1.442695, %v342_v38  ;;  %v359_v45 = vmul.f32 1.442695, %v346_v39 }
  0xe1   : > { %636 = vpow2.f32 %v357_v37  ;;  %v343_v46 = vmin.f32 %v335_v40, 60.0  ;;  %v347_v47 = vmin.f32 %v339_v41, 60.0  ;;  %v336_v48 = vsub.f32 0.0, %v321_v42 }
  0xe2   : > { %638 = vpow2.f32 %v351_v44  ;;  %v340_v49 = vsub.f32 0.0, %v331_v43 }
  0xe3   : > { %640 = vpow2.f32 %v359_v45  ;;  %v353_v50 = vmul.f32 1.442695, %v343_v46  ;;  %v361_v51 = vmul.f32 1.442695, %v347_v47  ;;  %v344_v52 = vmin.f32 %v336_v48, 60.0 }
  0xe4   : > { %v348_v53 = vmin.f32 %v340_v49, 60.0 }
  0xe5   : > { %642 = vpow2.f32 %v353_v50  ;;  %v355_v54 = vmul.f32 1.442695, %v344_v52 }
  0xe6   : > { %644 = vpow2.f32 %v361_v51  ;;  %v363_v55 = vmul.f32 1.442695, %v348_v53 }
  0xe7   : > { %646 = vpow2.f32 %v355_v54 }
  0xe8   : > { %648 = vpow2.f32 %v363_v55 }
  0xed   : > { %v635_v56 = vpop.eup %634 }
  0xee   : > { %v637_v57 = vpop.eup %636  ;;  %v365_v58 = vadd.f32 1.0, %v635_v56 }
  0xef   : > { %v639_v59 = vpop.eup %638  ;;  %v369_v61 = vadd.f32 1.0, %v637_v57 }
  0xf0   : > { %v641_v60 = vpop.eup %640  ;;  %650 = vrcp.f32 %v365_v58  ;;  %v366_v62 = vadd.f32 1.0, %v639_v59 }
  0xf1   : > { %v370_v63 = vadd.f32 1.0, %v641_v60 }
  0xf2   : > { %v643_v0 = vpop.eup %642  ;;  %652 = vrcp.f32 %v366_v62 }
  0xf3   : > { %v645_v1 = vpop.eup %644  ;;  %654 = vrcp.f32 %v370_v63  ;;  %v367_v2 = vadd.f32 1.0, %v643_v0 }
  0xf4   : > { %v647_v3 = vpop.eup %646  ;;  %656 = vrcp.f32 %v369_v61  ;;  %v371_v4 = vadd.f32 1.0, %v645_v1 }
  0xf5   : > { %v649_v5 = vpop.eup %648  ;;  %658 = vrcp.f32 %v367_v2  ;;  %v368_v6 = vadd.f32 1.0, %v647_v3 }
  0xf6   : > { %660 = vrcp.f32 %v371_v4  ;;  %v372_v7 = vadd.f32 1.0, %v649_v5 }
  0xf7   : > { %662 = vrcp.f32 %v368_v6 }
  0xf8   : > { %664 = vrcp.f32 %v372_v7 }
  0xfd   : > { %v651_v8 = vpop.eup %650 }
  0xfe   : > { %v381_v11 = vmul.f32 %v651_v8, %v754_v16 }
  0xff   : > { %v653_v9 = vpop.eup %652 }
 0x100   : > { %v655_v10 = vpop.eup %654  ;;  %v382_v12 = vmul.f32 %v653_v9, %v760_v22 }
 0x101   : > { %v657_v13 = vpop.eup %656  ;;  %v386_v15 = vmul.f32 %v655_v10, %v762_v23 }
 0x102   : > { %v659_v14 = vpop.eup %658  ;;  %v401_v18 = vmax.f32 %v381_v11, %v382_v12  ;;  %v385_v21 = vmul.f32 %v657_v13, %v756_v17  ;;  %v389_v30 = vadd.f32 %v382_v12, %v381_v11 }
 0x103   : > { %v661_v19 = vpop.eup %660  ;;  %v383_v25 = vmul.f32 %v659_v14, %v766_v32 }
 0x104   : > { %v663_v20 = vpop.eup %662  ;;  %402 = vmax.xlane.f32.xlu0 %v401_v18  ;;  %v407_v28 = vmax.f32 %v385_v21, %v386_v15  ;;  %v387_v16 = vmul.f32 %v661_v19, %v768_v33  ;;  %v395_v31 = vadd.f32 %v386_v15, %v385_v21 }
 0x105   : > { %v665_v24 = vpop.eup %664  ;;  %v384_v26 = vmul.f32 %v663_v20, %v321_v42 }
 0x106   : > { %v388_v27 = vmul.f32 %v665_v24, %v331_v43 }
 0x107   : > { %v404_v29 = vmax.f32 %v383_v25, %v384_v26  ;;  %v392_v23 = vadd.f32 %v384_v26, %v383_v25 }
 0x108   : > { %408 = vmax.xlane.f32.xlu0 %v407_v28  ;;  %v410_v22 = vmax.f32 %v387_v16, %v388_v27  ;;  %v398_v17 = vadd.f32 %v388_v27, %v387_v16 }
 0x109   : > { %405 = vmax.xlane.f32.xlu1 %v404_v29 }
 0x10c   : > { %411 = vmax.xlane.f32.xlu0 %v410_v22 }
 0x10d   : > { %390 = vadd.xlane.f32.xlu1 %v389_v30 }
 0x110   : > { %393 = vadd.xlane.f32.xlu0 %v392_v23 }
 0x111   : > { %396 = vadd.xlane.f32.xlu1 %v395_v31 }
 0x114   : > { %399 = vadd.xlane.f32.xlu0 %v398_v17 }
 0x18d   : > { %v403_v32 = vpop.xlane.xlu0 %402 }
 0x18e   : > { %422 = vst.msk [vmem:[#allocation3] sm:$0xff] %vm417_vm2, %v403_v32 }
 0x191   : > { %v409_v34 = vpop.xlane.xlu0 %408 }
 0x192   : > { %v406_v35 = vpop.xlane.xlu1 %405  ;;  %424 = vst.msk [vmem:[#allocation3 + $0x10] sm:$0xff] %vm417_vm2, %v409_v34 }
 0x193   : > { %423 = vst.msk [vmem:[#allocation3 + $0x8] sm:$0xff] %vm417_vm2, %v406_v35 }
 0x195   : > { %v412_v33 = vpop.xlane.xlu0 %411  ;;  %v462_v36 = vld [vmem:[#allocation3] sm:$0xff] }
 0x196   : > { %425 = vst.msk [vmem:[#allocation3 + $0x18] sm:$0xff] %vm417_vm2, %v412_v33  ;;  %v391_v37 = vpop.xlane.xlu1 %390  ;;  %470 = vrot.lane.b32.xlu1 %v462_v36, %s691_s5 }
 0x197   : > { %418 = vst.msk [vmem:[#allocation2] sm:$0xff] %vm417_vm2, %v391_v37 }
 0x199   : > { %v394_v38 = vpop.xlane.xlu0 %393  ;;  %v464_v39 = vld [vmem:[#allocation3 + $0x10] sm:$0xff] }
 0x19a   : > { %419 = vst.msk [vmem:[#allocation2 + $0x8] sm:$0xff] %vm417_vm2, %v394_v38  ;;  %v397_v40 = vpop.xlane.xlu1 %396  ;;  %v463_v41 = vld [vmem:[#allocation3 + $0x8] sm:$0xff]  ;;  %474 = vrot.lane.b32.xlu1 %v464_v39, %s691_s5 }
 0x19b   : > { %420 = vst.msk [vmem:[#allocation2 + $0x10] sm:$0xff] %vm417_vm2, %v397_v40  ;;  %472 = vrot.lane.b32.xlu0 %v463_v41, %s691_s5 }
 0x19d   : > { %v400_v42 = vpop.xlane.xlu0 %399  ;;  %v465_v43 = vld [vmem:[#allocation3 + $0x18] sm:$0xff] }
 0x19e   : > { %421 = vst.msk [vmem:[#allocation2 + $0x18] sm:$0xff] %vm417_vm2, %v400_v42  ;;  %476 = vrot.lane.b32.xlu1 %v465_v43, %s691_s5  ;;  %v458_v44 = vld [vmem:[#allocation2] sm:$0xff] }
 0x1a1   : > { %v459_v49 = vld [vmem:[#allocation2 + $0x8] sm:$0xff] }
 0x1a2   : > { %v460_v47 = vld [vmem:[#allocation2 + $0x10] sm:$0xff] }
 0x1a5   : > { %v461_v53 = vld [vmem:[#allocation2 + $0x18] sm:$0xff] }
 0x208   : > { %v471_v45 = vpop.permute.xlu1 %470 }
 0x209   : > { %v483_v46 = vsel %vm417_vm2, %v458_v44, %v471_v45 }
 0x20a   : > { %488 = vst.msk [vmem:[%s222_s9] sm:$0xff] %vm487_vm3, %v483_v46 }
 0x20c   : > { %v475_v48 = vpop.permute.xlu1 %474 }
 0x20d   : > { %v473_v50 = vpop.permute.xlu0 %472  ;;  %v485_v51 = vsel %vm417_vm2, %v460_v47, %v475_v48 }
 0x20e   : > { %v484_v52 = vsel %vm417_vm2, %v459_v49, %v473_v50  ;;  %490 = vst.msk [vmem:[%s222_s9 + $0x10] sm:$0xff] %vm487_vm3, %v485_v51 }
 0x20f   : > { %489 = vst.msk [vmem:[%s222_s9 + $0x8] sm:$0xff] %vm487_vm3, %v484_v52 }
 0x210   : > { %v477_v54 = vpop.permute.xlu1 %476 }
 0x211   : > { %v486_v55 = vsel %vm417_vm2, %v461_v53, %v477_v54 }
 0x212   : > { %491 = vst.msk [vmem:[%s222_s9 + $0x18] sm:$0xff] %vm487_vm3, %v486_v55 }
 0x213 PF: > { %s13_s14 = sadd.s32 1, %s688_s14   ;;  %s811_s12 = smov %s684_s13 }
 0x214   : > { %p10_p5 = scmp.ge.s32.totalorder %s13_s14, 4   ;;  %s812_s13 = smov %s814_s15 }
 0x216   :  { %12 = sbr.rel (!%p10_p5) target bundleno = 2 (0x2), region = 74 }

</bundles_post_ra>
